<compile_context>
chip_gen: v7x
topology: tpu7x:2x2x1
jax: 0.10.0
libtpu: 0.0.40
codegen_flags: <defaults>
</compile_context>

<pallas_src>
import jax
import jax.numpy as jnp
from jax import lax
from jax.experimental import pallas as pl
from jax.experimental.pallas import tpu as pltpu


_VMEM_LIMIT = 32 * 1024 * 1024  # safe on v5e/v6e (128 MiB phys) and v7x (64 MiB phys)


def _pick_tile(n, target, quantum):
    """Largest divisor of `n` that is a multiple of `quantum` and <= `target`.

    Falls back to `n` (full extent, always a legal block size)."""
    if n <= target:
        return n
    d = (target // quantum) * quantum
    while d >= quantum:
        if n % d == 0:
            return d
        d -= quantum
    return n


# ----------------------------------------------------------------------------
# Kernel 1: per-pixel best utility + best granularity index (argmax over G)
# ----------------------------------------------------------------------------
def _argmax_kernel(util_ref, best_u_ref, best_g_ref):
    # util_ref:   (1, G, nt)  utility per granularity, pixels lane-dense
    # best_*_ref: (1, 1, nt)
    num_g = util_ref.shape[1]
    best_u = util_ref[0, 0]                          # (nt,)
    best_g = jnp.zeros(best_u.shape, jnp.int32)
    for g in range(1, num_g):                        # G is tiny & static -> unrolled
        u = util_ref[0, g]
        upd = u > best_u                             # strict '>' keeps first max (torch semantics)
        best_g = jnp.where(upd, g, best_g)
        best_u = jnp.where(upd, u, best_u)
    best_u_ref[0, 0] = best_u
    best_g_ref[0, 0] = best_g


def per_pixel_best(util_bgn, *, lane_tile=8192):
    """(B, G, N) utility -> (best utility f32, best granularity int32), each (B, N)."""
    B, G, N = util_bgn.shape
    nt = _pick_tile(N, lane_tile, 128)
    best_u, best_g = pl.pallas_call(
        _argmax_kernel,
        out_shape=(
            jax.ShapeDtypeStruct((B, 1, N), util_bgn.dtype),
            jax.ShapeDtypeStruct((B, 1, N), jnp.int32),
        ),
        grid=(B, N // nt),
        in_specs=[pl.BlockSpec((1, G, nt), lambda b, n: (b, 0, n))],
        out_specs=(
            pl.BlockSpec((1, 1, nt), lambda b, n: (b, 0, n)),
            pl.BlockSpec((1, 1, nt), lambda b, n: (b, 0, n)),
        ),
        compiler_params=pltpu.CompilerParams(
            dimension_semantics=("parallel", "parallel"),
            vmem_limit_bytes=_VMEM_LIMIT,
        ),
    )(util_bgn)
    return best_u.reshape(B, N), best_g.reshape(B, N)


# ----------------------------------------------------------------------------
# Kernel 2: build sparse transmitted BEV (one select per element)
# ----------------------------------------------------------------------------
def _build_sparse_kernel(sel_ref, grp_ref, bev_ref, out_ref):
    # sel_ref: (1, 1, nb) int32   selected granularity per pixel (-1 = do not send)
    # grp_ref: (cb, 1)    int32   granularity id that owns each channel
    # bev_ref / out_ref: (1, cb, nb)
    mask = grp_ref[...] == sel_ref[0]                # (cb,1) == (1,nb) -> (cb,nb)
    out_ref[0] = jnp.where(mask, bev_ref[0], 0.0)


def build_sparse_bev(bev_bcn, sel_bn, chan_group, *, chan_tile=64, lane_tile=4096):
    B, C, N = bev_bcn.shape
    cb = _pick_tile(C, chan_tile, 8)
    nb = _pick_tile(N, lane_tile, 128)
    # TODO(synk): pass input_output_aliases={2: 0} when the caller no longer needs
    #             collab_bev, to reuse its HBM buffer for the sparse output.
    return pl.pallas_call(
        _build_sparse_kernel,
        out_shape=jax.ShapeDtypeStruct((B, C, N), bev_bcn.dtype),
        grid=(B, C // cb, N // nb),
        in_specs=[
            pl.BlockSpec((1, 1, nb), lambda b, c, n: (b, 0, n)),    # sel
            pl.BlockSpec((cb, 1), lambda b, c, n: (c, 0)),          # channel -> granularity id
            pl.BlockSpec((1, cb, nb), lambda b, c, n: (b, c, n)),   # dense BEV
        ],
        out_specs=pl.BlockSpec((1, cb, nb), lambda b, c, n: (b, c, n)),
        compiler_params=pltpu.CompilerParams(
            dimension_semantics=("parallel", "parallel", "parallel"),
            vmem_limit_bytes=_VMEM_LIMIT,
        ),
    )(sel_bn.reshape(B, 1, N), chan_group, bev_bcn)


# ----------------------------------------------------------------------------
# Greedy per-sample bandwidth allocation (sequential, data-dependent).
# TODO(synk): the global sort + greedy budget walk stays in plain JAX (stable
#             argsort + unrolled lax.scan); a scalar-unit SMEM Pallas loop is
#             possible but the full argsort dominates either way, and a top-K
#             shortcut would change the reference semantics.
# ----------------------------------------------------------------------------
def greedy_select(best_u, best_g, bandwidth_costs, budget_per_sample, threshold,
                  *, unroll=128):
    B, N = best_u.shape
    order = jnp.argsort(-best_u, axis=1)              # stable, descending utility
    u_s = jnp.take_along_axis(best_u, order, axis=1)
    g_s = jnp.take_along_axis(best_g, order, axis=1)
    costs = jnp.asarray(bandwidth_costs, jnp.float32)
    c_s = jnp.take(costs, g_s, axis=0)                # cost of the best granularity
    budget = jnp.float32(budget_per_sample)
    # Fold eligibility into the cost: ineligible pixels can never fit.
    c_eff = jnp.where(u_s > jnp.float32(threshold), c_s, jnp.float32(jnp.inf))

    def step(usage, c_i):                             # usage, c_i: (B,)
        fits = usage + c_i <= budget
        return usage + jnp.where(fits, c_i, 0.0), fits

    _, picked = lax.scan(step, jnp.zeros((B,), jnp.float32), c_eff.T,
                         unroll=min(int(unroll), N))
    chosen = jnp.where(picked.T, g_s, -1).astype(jnp.int32)   # (B, N) in sorted order
    rows = jnp.arange(B)[:, None]
    sel = jnp.full((B, N), -1, jnp.int32).at[rows, order].set(chosen)
    return sel


# ----------------------------------------------------------------------------
# Module wrapper
# ----------------------------------------------------------------------------
class TransmissionSelectorPallas:
    def __init__(self, C_V, C_F, C_D, bandwidth_costs, utility_network=None,
                 no_transmission_utility_penalty=0.0):
        self.C_V = int(C_V)
        self.C_F = int(C_F)
        self.C_D = int(C_D)
        self.bandwidth_costs = tuple(float(c) for c in bandwidth_costs)
        self.num_granularities = len(self.bandwidth_costs)
        self.total_channels_out = self.C_V + self.C_F + self.C_D
        self.no_transmission_utility_penalty = float(no_transmission_utility_penalty)
        self.utility_network = utility_network        # unused in forward (parity with torch)
        parts = [jnp.full((c,), g, jnp.int32)
                 for g, c in enumerate((self.C_V, self.C_F, self.C_D)) if c > 0]
        self.chan_group = jnp.concatenate(parts).reshape(-1, 1)   # (C_total, 1) int32

    def __call__(self, collab_bev_data_list, bandwidth_budget, utility_map_list):
        cav_num = collab_bev_data_list.shape[0]
        B, H, W, G = utility_map_list.shape
        assert G == self.num_granularities, "Utility map granularity dim mismatch"
        N = H * W
        C = self.total_channels_out

        # kernel 1: per-pixel best utility / granularity.
        # TODO(synk): this transpose disappears if the utility producer emits
        #             channel-first (B, G, H, W) maps; kept here only to preserve
        #             the torch (B, H, W, G) input convention.
        util_bgn = jnp.transpose(utility_map_list, (0, 3, 1, 2)).reshape(B, G, N)
        best_u, best_g = per_pixel_best(util_bgn)

        # greedy bandwidth allocation (plain JAX, per-sample budgets).
        sel = greedy_select(best_u, best_g, self.bandwidth_costs,
                            bandwidth_budget / cav_num,
                            self.no_transmission_utility_penalty)

        # kernel 2: sparse transmitted BEV.
        bev = collab_bev_data_list[:, :C].reshape(B, C, N)
        sparse = build_sparse_bev(bev, sel, self.chan_group).reshape(B, C, H, W)
        sel_idx = sel.astype(jnp.float32).reshape(B, H, W)   # torch returns float (-1.0 / g)
        return sparse, sel_idx


if __name__ == "__main__":
    key = jax.random.PRNGKey(0)
    B, H, W = 2, 16, 16
    C_V, C_F, C_D = 4, 4, 4
    bandwidth_costs = [4.0, 2.0, 1.0]
    bandwidth_budget = 100.0
    G = len(bandwidth_costs)
    C = C_V + C_F + C_D

    k1, k2 = jax.random.split(key)
    collab_bev = jax.random.normal(k1, (B, C, H, W), jnp.float32)
    utility_map = jax.random.normal(k2, (B, H, W, G), jnp.float32)

    model = TransmissionSelectorPallas(C_V, C_F, C_D, bandwidth_costs)
    sparse_bev, sel_idx = model(collab_bev, bandwidth_budget, utility_map)
    jax.block_until_ready((sparse_bev, sel_idx))

    assert sparse_bev.shape == (B, C, H, W)
    assert sel_idx.shape == (B, H, W)

    # --- sanity checks against plain-JAX references ---------------------------
    # kernel 1: per-pixel max / first-argmax over the granularity axis
    util_bgn = jnp.transpose(utility_map, (0, 3, 1, 2)).reshape(B, G, H * W)
    bu, bg = per_pixel_best(util_bgn)
    assert jnp.array_equal(bu, jnp.max(utility_map, axis=-1).reshape(B, -1))
    assert jnp.array_equal(bg, jnp.argmax(utility_map, axis=-1).reshape(B, -1).astype(jnp.int32))

    # kernel 2: masked copy by selected granularity
    grp = jnp.concatenate([jnp.full((C_V,), 0, jnp.int32),
                           jnp.full((C_F,), 1, jnp.int32),
                           jnp.full((C_D,), 2, jnp.int32)])
    ref_sparse = jnp.where(
        sel_idx.astype(jnp.int32)[:, None, :, :] == grp[None, :, None, None],
        collab_bev, 0.0)
    assert jnp.array_equal(sparse_bev, ref_sparse)

    print("KERNEL_OK")
</pallas_src>

<mosaic_0001>
module attributes {stable_mosaic.version = 11 : i64} {
  func.func @_argmax_kernel(%arg0: i32, %arg1: i32, %arg2: memref<1x3x256xf32, #tpu.memory_space<vmem>>, %arg3: memref<1x1x256xf32, #tpu.memory_space<vmem>>, %arg4: memref<1x1x256xi32, #tpu.memory_space<vmem>>) attributes {dimension_semantics = [#tpu.dimension_semantics<parallel>, #tpu.dimension_semantics<parallel>], iteration_bounds = array<i64: 2, 1>, scalar_prefetch = 0 : i64, scratch_operands = 0 : i64, tpu.core_type = #tpu.core_type<tc>, window_params = [{transform_indices = @transform_0, window_bounds = array<i64: 1, 3, 256>}, {transform_indices = @transform_1, window_bounds = array<i64: 1, 1, 256>}, {transform_indices = @transform_2, window_bounds = array<i64: 1, 1, 256>}]} {
    %c0 = arith.constant 0 : index
    %c0_0 = arith.constant 0 : index
    %c0_1 = arith.constant 0 : index
    %0 = vector.load %arg2[%c0, %c0_0, %c0_1] : memref<1x3x256xf32, #tpu.memory_space<vmem>>, vector<1x1x256xf32>
    %1 = vector.shape_cast %0 : vector<1x1x256xf32> to vector<256xf32>
    %c0_i32 = arith.constant 0 : i32
    %2 = vector.broadcast %c0_i32 : i32 to vector<256xi32>
    %c0_2 = arith.constant 0 : index
    %c1 = arith.constant 1 : index
    %c0_3 = arith.constant 0 : index
    %3 = vector.load %arg2[%c0_2, %c1, %c0_3] : memref<1x3x256xf32, #tpu.memory_space<vmem>>, vector<1x1x256xf32>
    %4 = vector.shape_cast %3 : vector<1x1x256xf32> to vector<256xf32>
    %5 = arith.cmpf ogt, %4, %1 : vector<256xf32>
    %c1_i32 = arith.constant 1 : i32
    %6 = vector.broadcast %c1_i32 : i32 to vector<256xi32>
    %7 = arith.select %5, %6, %2 : vector<256xi1>, vector<256xi32>
    %8 = arith.select %5, %4, %1 : vector<256xi1>, vector<256xf32>
    %c0_4 = arith.constant 0 : index
    %c2 = arith.constant 2 : index
    %c0_5 = arith.constant 0 : index
    %9 = vector.load %arg2[%c0_4, %c2, %c0_5] : memref<1x3x256xf32, #tpu.memory_space<vmem>>, vector<1x1x256xf32>
    %10 = vector.shape_cast %9 : vector<1x1x256xf32> to vector<256xf32>
    %11 = arith.cmpf ogt, %10, %8 : vector<256xf32>
    %c2_i32 = arith.constant 2 : i32
    %12 = vector.broadcast %c2_i32 : i32 to vector<256xi32>
    %13 = arith.select %11, %12, %7 : vector<256xi1>, vector<256xi32>
    %14 = arith.select %11, %10, %8 : vector<256xi1>, vector<256xf32>
    %c0_6 = arith.constant 0 : index
    %c0_7 = arith.constant 0 : index
    %c0_8 = arith.constant 0 : index
    %15 = vector.load %arg3[%c0_6, %c0_7, %c0_8] : memref<1x1x256xf32, #tpu.memory_space<vmem>>, vector<1x1x256xf32>
    %16 = vector.shape_cast %15 : vector<1x1x256xf32> to vector<256xf32>
    %17 = vector.shape_cast %14 : vector<256xf32> to vector<1x1x256xf32>
    tpu.vector_store %arg3[%c0_6, %c0_7, %c0_8], %17 {strides = array<i32>} : memref<1x1x256xf32, #tpu.memory_space<vmem>>, vector<1x1x256xf32>,
    %c0_9 = arith.constant 0 : index
    %c0_10 = arith.constant 0 : index
    %c0_11 = arith.constant 0 : index
    %18 = vector.load %arg4[%c0_9, %c0_10, %c0_11] : memref<1x1x256xi32, #tpu.memory_space<vmem>>, vector<1x1x256xi32>
    %19 = vector.shape_cast %18 : vector<1x1x256xi32> to vector<256xi32>
    %20 = vector.shape_cast %13 : vector<256xi32> to vector<1x1x256xi32>
    tpu.vector_store %arg4[%c0_9, %c0_10, %c0_11], %20 {strides = array<i32>} : memref<1x1x256xi32, #tpu.memory_space<vmem>>, vector<1x1x256xi32>,
    return
  }
  func.func @transform_0(%arg0: i32, %arg1: i32) -> (i32, i32, i32) {
    %c0_i32 = arith.constant 0 : i32
    %c0_i32_0 = arith.constant 0 : i32
    return %arg0, %c0_i32, %arg1 : i32, i32, i32
  }
  func.func @transform_1(%arg0: i32, %arg1: i32) -> (i32, i32, i32) {
    %c0_i32 = arith.constant 0 : i32
    %c0_i32_0 = arith.constant 0 : i32
    return %arg0, %c0_i32, %arg1 : i32, i32, i32
  }
  func.func @transform_2(%arg0: i32, %arg1: i32) -> (i32, i32, i32) {
    %c0_i32 = arith.constant 0 : i32
    %c0_i32_0 = arith.constant 0 : i32
    return %arg0, %c0_i32, %arg1 : i32, i32, i32
  }
}

</mosaic_0001>

<bundles_post_ra>
// kernel: tpu_custom_call.1
= control target key start
LH: loop header
LB: loop body
LE: loop exit
PB: predicated region body
PF: predicated region fallthrough
CT: control target
= control target key end

     0   :  { %8 = vsyncpa [#allocation3], 0  ;;  %s711_s0 = inlined_call_operand.vmem [shape: f32[2,3,256], index: 0, kind: input, shape index: {}]   ;;  %s712_s1 = inlined_call_operand.hbm [shape: f32[2,1,256], index: 1, kind: output, shape index: {0}]   ;;  %s713_s2 = inlined_call_operand.hbm [shape: s32[2,1,256], index: 2, kind: output, shape index: {1}]  }
   0x1   :  { %10 = vsyncpa [#allocation3 + $0x1], 0 }
   0x2   :  { %11 = vsyncpa [#allocation5], 0 }
   0x3   :  { %13 = vsyncpa [#allocation5 + $0x1], 0  ;;  %s566_s9 = smov 0   ;;  %s568_s10 = smov 0  }
   0x4   :  { %s570_s11 = smov 0   ;;  %s572_s12 = smov 0  }
   0x5   :  { %s574_s13 = smov 0   ;;  %s576_s14 = smov 0  }
   0x6 LB: > { %s353_s15 = sadd.s32 4294967295, %s546_s14   ;;  %s354_s16 = sadd.s32 4294967294, %s546_s14   ;;  %s546_s14 = sphi %s576_s14, %s19_s14   ;;  %s542_s13 = sphi %s574_s13, %s720_s13   ;;  %s538_s12 = sphi %s572_s12, %s719_s12   ;;  %s534_s11 = sphi %s570_s11, %s718_s11   ;;  %s530_s10 = sphi %s568_s10, %s717_s10   ;;  %s526_s9 = sphi %s566_s9, %s716_s9  }
   0x7   : > { %s31_s17 = sadd.s32 1, %s542_s13  ;;  %s68_s18 = sadd.s32 1, %s534_s11 }
   0x8   : > { %p33_p0 = scmp.ge.s32.totalorder %s31_s17, 2  ;;  %p78_p1 = scmp.ne.s32.totalorder %s534_s11, %s530_s10 }
   0x9   : > { %p79_p2 = scmp.eq.s32.totalorder %s353_s15, 1  ;;  %p84_p3 = scmp.ne.s32.totalorder %s530_s10, %s526_s9 }
   0xa   : > { %s722_s17 = smov (%p33_p0, %s31_s17), 0  ;;  %p85_p5 = scmp.eq.s32.totalorder %s354_s16, 1 }
   0xb   : > { %p606_p4 = por %p79_p2, %p78_p1  ;;  %s63_s20 = ssub.s32 %s542_s13, %s722_s17 }
   0xc   : > { %p357_p6 = scmp.ge.s32.totalorder %s546_s14, 1  ;;  %p66_p7 = scmp.eq.s32.totalorder %s63_s20, 0 }
   0xd   : > { %p613_p8 = por %p85_p5, %p84_p3  ;;  %p144_p9 = scmp.lt.s32.totalorder %s546_s14, 3 }
   0xe   : > { %s619_s22 = scalar_select %p66_p7, %s534_s11, %s68_s18  }
   0xf   : > { %p145_p10 = pnand %p357_p6, %p144_p9 }
  0x10   : > { %s622_s23 = sand.u32 (!%p145_p10), 1, %s530_s10   ;;  %p176_p11 = scmp.lt.s32.totalorder (!%p145_p10), %s538_s12, 1  ;;  %v198_v0 = vlaneseq (!%p145_p10)  ;;  %v548_v5 = vmov (!%p145_p10), 0  }
  0x11   : > { %148 = sbr.rel (%p145_p10) target bundleno = 73 (0x49), region = 24  ;;  %s358_s24 = sshll.u32 (!%p145_p10), %s622_s23, 1 }
  0x12   : > { %s167_s27 = scalar_lea.vmem (!%p145_p10), [#allocation2], %s358_s24  ;;  %s174_s4 = scalar_lea.vmem (!%p145_p10), [#allocation4], %s358_s24  ;;  %vm200_vm1 = vcmp.lt.s32.totalorder (!%p145_p10), %v198_v0, 256 }
  0x13   : > { %s226_s28 = sshll.u32 (!%p145_p10), %s167_s27, 4  ;;  %s242_s5 = sshll.u32 (!%p145_p10), %s174_s4, 4  ;;  %s631_s28 = int_to_ptr.vmem [resolvable:$true] %s226_s28  ;;  %s633_s5 = int_to_ptr.vmem [resolvable:$true] %s242_s5 }
  0x14   : > { %s373_s6 = sshll.u32 (!%p145_p10), %s538_s12, 5  ;;  %s205_s20 = scalar_lea.sflag (!%p145_p10), [#allocation3], %s622_s23 }
  0x15   : > { %s638_s15 = scalar_lea.hbm (!%p145_p10), %s712_s1, %s373_s6  ;;  %s643_s18 = scalar_lea.hbm (!%p145_p10), %s713_s2, %s373_s6 }
  0x16   : > { %s436_s24 = scalar_lea.vmem (!%p145_p10), %s631_s28, 32 }
  0x17   : > { %p437_p12 = scmp.ne.s32.totalorder (!%p145_p10), %s631_s28, %s436_s24 }
  0x18   : > { %s177_s25 = scalar_select %p176_p11, %s538_s12, 1 }
  0x19   : > { %p438_p13 = pnand %p437_p12, %p606_p4 }
  0x1a   : > { %s372_s26 = sshll.u32 %s177_s25, 3  ;;  %s549_s25 = smov [#allocation2]  }
  0x1b   : > { %s183_s3 = scalar_lea.vmem %s711_s0, %s372_s26  ;;  %p439_p0 = pneg %p438_p13 }
  0x1c   : > { %v187_v1 = vld [vmem:[%s183_s3] ss:$4 sm:$0x3]  ;;  %v362_v2 = vld [vmem:[%s183_s3 + $0x1] ss:$4 sm:$0x3] }
  0x1d   : > { %vm190_vm0 = vcmp.gt.f32.partialorder %v362_v2, %v187_v1  ;;  %v363_v3 = vld [vmem:[%s183_s3 + $0x2] ss:$4 sm:$0x3]  ;;  %s440_s26 = sshll.u32 %s549_s25, 4  ;;  %s441_s26 = int_to_ptr.vmem [resolvable:$false] %s440_s26 }
  0x1e   : > { %v192_v4 = vsel %vm190_vm0, %v362_v2, %v187_v1  ;;  %v191_v6 = vsel %vm190_vm0, 1, %v548_v5  ;;  %s442_s29 = scalar_lea.vmem %s441_s26, 64  ;;  %p443_p1 = scmp.lt.s32.totalorder %s631_s28, %s441_s26 }
  0x1f   : > { %vm195_vm2 = vcmp.gt.f32.partialorder %v363_v3, %v192_v4  ;;  %p444_p2 = scmp.lt.s32.totalorder %s442_s29, %s436_s24 }
  0x20   : > { %v197_v7 = vsel %vm195_vm2, %v363_v3, %v192_v4  ;;  %v196_v8 = vsel %vm195_vm2, 2, %v191_v6 }
  0x21   : > { %202 = vst.msk [vmem:[%s167_s27] sm:$0x3] %vm200_vm1, %v197_v7  ;;  %203 = vst.msk [vmem:[%s174_s4] sm:$0x3] %vm200_vm1, %v196_v8  ;;  %p445_p3 = por %p444_p2, %p443_p1 }
  0x23   : > { %p446_p5 = pnand %p445_p3, %p439_p0 }
  0x25   : > { %449 = shalt.err (!%p446_p5)
}
  0x26   : > { %s450_s27 = scalar_lea.hbm %s638_s15, 32  ;;  %s454_s4 = scalar_lea.hbm %s712_s1, 64 }
  0x27   : > { %p451_p6 = scmp.ne.s32.totalorder %s638_s15, %s450_s27  ;;  %p455_p10 = scmp.lt.u32.totalorder %s638_s15, %s712_s1 }
  0x28   : > { %p456_p11 = scmp.lt.u32.totalorder %s454_s4, %s450_s27  ;;  %p458_p13 = scmp.lt.u32.totalorder %s450_s27, %s638_s15 }
  0x29   : > { %p452_p7 = pnand %p451_p6, %p606_p4 }
  0x2a   : > { %p457_p12 = por %p456_p11, %p455_p10 }
  0x2b   : > { %p453_p9 = pneg %p452_p7 }
  0x2c   : > { %p459_p0 = por %p458_p13, %p457_p12 }
  0x2e   : > { %p460_p1 = pnand %p459_p0, %p453_p9 }
  0x30   : > { %463 = shalt.err (!%p460_p1)
}
  0x31   : > { %375 = dma.vmem_to_hbm [thread:$0]  (%p606_p4), %s631_s28, 32, %s638_s15, %s205_s20  }
  0x32   : > { %s210_s8 = scalar_lea.sflag [#allocation5], %s622_s23  ;;  %s464_s12 = scalar_lea.vmem %s633_s5, 32 }
  0x33   : > { %p465_p2 = scmp.ne.s32.totalorder %s633_s5, %s464_s12  ;;  %s550_s16 = smov [#allocation4]  }
  0x34   : > { %s468_s24 = sshll.u32 %s550_s16, 4  ;;  %s469_s24 = int_to_ptr.vmem [resolvable:$false] %s468_s24 }
  0x35   : > { %p466_p3 = pnand %p465_p2, %p606_p4  ;;  %s470_s25 = scalar_lea.vmem %s469_s24, 64 }
  0x36   : > { %p471_p6 = scmp.lt.s32.totalorder %s633_s5, %s469_s24  ;;  %p472_p7 = scmp.lt.s32.totalorder %s470_s25, %s464_s12 }
  0x37   : > { %p467_p5 = pneg %p466_p3 }
  0x38   : > { %p473_p9 = por %p472_p7, %p471_p6 }
  0x3a   : > { %p474_p10 = pnand %p473_p9, %p467_p5 }
  0x3c   : > { %477 = shalt.err (!%p474_p10)
}
  0x3d   : > { %s478_s23 = scalar_lea.hbm %s643_s18, 32  ;;  %s482_s20 = scalar_lea.hbm %s713_s2, 64 }
  0x3e   : > { %p479_p11 = scmp.ne.s32.totalorder %s643_s18, %s478_s23  ;;  %p483_p0 = scmp.lt.u32.totalorder %s643_s18, %s713_s2 }
  0x3f   : > { %p484_p1 = scmp.lt.u32.totalorder %s482_s20, %s478_s23  ;;  %p486_p3 = scmp.lt.u32.totalorder %s478_s23, %s643_s18 }
  0x40   : > { %p480_p12 = pnand %p479_p11, %p606_p4 }
  0x41   : > { %p485_p2 = por %p484_p1, %p483_p0 }
  0x42   : > { %p481_p13 = pneg %p480_p12 }
  0x43   : > { %p487_p5 = por %p486_p3, %p485_p2 }
  0x45   : > { %p488_p6 = pnand %p487_p5, %p481_p13 }
  0x47   : > { %491 = shalt.err (!%p488_p6)
}
  0x48   : > { %376 = dma.vmem_to_hbm [thread:$0]  (%p606_p4), %s633_s5, 32, %s643_s18, %s210_s8  }
  0x49 PF: > { %p386_p7 = scmp.ge.s32.totalorder %s546_s14, 2  ;;  %s254_s27 = sand.u32 1, %s526_s9  }
  0x4a   : > { %s255_s30 = scalar_lea.sflag [#allocation3], %s254_s27 }
  0x4b   : > { %p380_p9 = pnand %p386_p7, %p613_p8 }
  0x4d   : > { %517 = dma.done.wait (!%p380_p9), %s255_s30, 32  }
  0x4e   : > { %519 = vsyncadd (!%p380_p9), %s255_s30, 4294967264  ;;  %s264_s3 = scalar_lea.sflag [#allocation5], %s254_s27 }
  0x4f   : > { %521 = dma.done.wait (!%p380_p9), %s264_s3, 32  }
  0x50   : > { %523 = vsyncadd (!%p380_p9), %s264_s3, 4294967264  ;;  %s19_s14 = sadd.s32 1, %s546_s14   ;;  %s716_s9 = smov %s530_s10 }
  0x51   : > { %p16_p10 = scmp.ge.s32.totalorder %s19_s14, 4   ;;  %s717_s10 = smov %s534_s11 }
  0x52   : > { %s718_s11 = smov %s619_s22  ;;  %s719_s12 = smov %s542_s13 }
  0x53   : > { %s720_s13 = smov %s722_s17  ;;  %18 = sbr.rel (!%p16_p10) target bundleno = 6 (0x6), region = 78 }
  0x5a   :  { %269 = vsyncpa [#allocation3], 1 }
  0x5b   :  { %271 = vsyncpa [#allocation3 + $0x1], 1 }
  0x5c   :  { %272 = vsyncpa [#allocation5], 1 }
  0x5d   :  { %274 = vsyncpa [#allocation5 + $0x1], 1 }

</bundles_post_ra>
